<compile_context>
chip_gen: v7x
topology: tpu7x:2x2x1
jax: 0.10.0
libtpu: 0.0.40
codegen_flags: <defaults>
</compile_context>

<pallas_src>
import jax
import jax.numpy as jnp
from jax.experimental import pallas as pl
from jax.experimental.pallas import tpu as pltpu

_LANES = 128


def _round_up(x, m):
    return ((x + m - 1) // m) * m


def _rpn_cls_loss_kernel(pred_ref, tgt_ref, sum_ref, cnt_ref):
    # pred_ref: (2, tm, 128) f32  -- [class, row, lane]; rows sublane-dense
    # tgt_ref : (tm, 128)   int32 -- labels in {-1, 0, 1}; padded anchors = -1
    x0 = pred_ref[0]                      # (tm, 128) class-0 logits
    x1 = pred_ref[1]                      # (tm, 128) class-1 logits
    t = tgt_ref[...]                      # (tm, 128) int32

    z = x1 - x0
    # Stable softplus(z) = max(z, 0) + log1p(exp(-|z|))  (exp/log1p on the EUP).
    sp = jnp.maximum(z, 0.0) + jnp.log1p(jnp.exp(-jnp.abs(z)))
    # label 0: nll = softplus(z); label 1: nll = softplus(-z) = softplus(z) - z
    nll = sp - jnp.where(t == 1, z, 0.0)

    keep = t != -1                        # drops ignored + padded anchors
    nll = jnp.where(keep, nll, 0.0)       # select (not multiply): garbage-proof
    cnt = keep.astype(jnp.float32)

    # Per-lane partials: sublane reduction only; full-width lane-dense stores.
    sum_ref[...] = jnp.sum(nll, axis=0, keepdims=True)   # (1, 128)
    cnt_ref[...] = jnp.sum(cnt, axis=0, keepdims=True)   # (1, 128)


def rpn_cls_loss(pred, target, k, max_rows_per_chunk=2048):
    """pred: (1, N, 2) float logits, target: (1, 1, N) int labels in {-1, 0, 1}."""
    cls_pred = pred[0].astype(jnp.float32)        # (N, 2)
    y_true = target[0, 0].astype(jnp.int32)       # (N,)
    N, C = cls_pred.shape
    assert C == 2, "CTPN RPN cls head has exactly 2 classes"

    # --- tiling: sublane-dense (tm, 128) tiles, tm a multiple of 8 ------------
    rows = max(1, -(-N // _LANES))                # anchor rows of 128
    rows8 = _round_up(rows, 8)
    num_chunks = max(1, -(-rows8 // max_rows_per_chunk))
    if num_chunks == 1 and rows8 >= 16:
        num_chunks = 2                            # v7x: keep both TensorCores busy
    tm = _round_up(-(-rows8 // num_chunks), 8)    # rows per grid step (mult of 8)
    rows_grid = num_chunks * tm
    n_grid = rows_grid * _LANES                   # padded anchor count

    # --- operand prep (one fused XLA pass per array) --------------------------
    # Class-major, padded, lane/sublane-dense view of the logits.
    pred_cm = jnp.pad(cls_pred.T, ((0, 0), (0, n_grid - N))).reshape(
        2, rows_grid, _LANES)
    # Labels: cast + pad with -1 (so padded anchors are masked in-kernel) + view.
    tgt_2d = jnp.pad(y_true, (0, n_grid - N), constant_values=-1).reshape(
        rows_grid, _LANES)

    sums, cnts = pl.pallas_call(
        _rpn_cls_loss_kernel,
        out_shape=(jax.ShapeDtypeStruct((1, num_chunks * _LANES), jnp.float32),
                   jax.ShapeDtypeStruct((1, num_chunks * _LANES), jnp.float32)),
        grid=(num_chunks,),
        in_specs=[
            pl.BlockSpec((2, tm, _LANES), lambda i: (0, i, 0)),   # logits tile
            pl.BlockSpec((tm, _LANES), lambda i: (i, 0)),         # label tile
        ],
        out_specs=(pl.BlockSpec((1, _LANES), lambda i: (0, i)),
                   pl.BlockSpec((1, _LANES), lambda i: (0, i))),
        compiler_params=pltpu.CompilerParams(
            dimension_semantics=("parallel",)),   # chunks independent -> 2 TCs on v7x
        cost_estimate=pl.CostEstimate(
            flops=8 * n_grid,
            transcendentals=2 * n_grid,
            bytes_accessed=12 * n_grid + 8 * num_chunks * _LANES),
    )(pred_cm, tgt_2d)

    total_sum = jnp.sum(sums)
    total_cnt = jnp.sum(cnts)
    # NOTE: if every label is -1 this is 0/0 = NaN, matching PyTorch's
    # mean-reduction nll_loss over an empty selection (then clamped).
    return jnp.clip(total_sum / total_cnt, 0.0, float(k))


def _reference(pred, target, k):
    """Pure-JAX reference of the PyTorch forward (masked mean CE, clamped)."""
    cls_pred = pred[0].astype(jnp.float32)
    y_true = target[0, 0].astype(jnp.int32)
    mask = (y_true != -1).astype(jnp.float32)
    logp = jax.nn.log_softmax(cls_pred, axis=-1)
    tl = jnp.take_along_axis(logp, jnp.maximum(y_true, 0)[:, None], axis=-1)[:, 0]
    loss = jnp.sum(-tl * mask) / jnp.sum(mask)
    return jnp.clip(loss, 0.0, float(k))


if __name__ == "__main__":
    key = jax.random.PRNGKey(0)
    k_clamp = 3.0

    # Small deterministic checks: a ragged size (exercises the padded tail)
    # and a 2-chunk size (exercises the parallel grid).
    for n in (300, 4096):
        key, kp, kt = jax.random.split(key, 3)
        pred = jax.random.normal(kp, (1, n, 2), dtype=jnp.float32)
        target = jax.random.randint(kt, (1, 1, n), -1, 2).astype(jnp.int32)

        loss = jax.block_until_ready(rpn_cls_loss(pred, target, k_clamp))
        ref = _reference(pred, target, k_clamp)
        assert jnp.allclose(loss, ref, rtol=1e-5, atol=1e-5), (n, loss, ref)

    print("KERNEL_OK")
</pallas_src>

<mosaic_0001>
module attributes {stable_mosaic.version = 11 : i64} {
  func.func @_rpn_cls_loss_kernel(%arg0: i32, %arg1: memref<2x8x128xf32, #tpu.memory_space<vmem>>, %arg2: memref<8x128xi32, #tpu.memory_space<vmem>>, %arg3: memref<1x128xf32, #tpu.memory_space<vmem>>, %arg4: memref<1x128xf32, #tpu.memory_space<vmem>>) attributes {dimension_semantics = [#tpu.dimension_semantics<parallel>], iteration_bounds = array<i64: 1>, scalar_prefetch = 0 : i64, scratch_operands = 0 : i64, tpu.core_type = #tpu.core_type<tc>, window_params = [{transform_indices = @transform_0, window_bounds = array<i64: 2, 8, 128>}, {transform_indices = @transform_1, window_bounds = array<i64: 8, 128>}, {transform_indices = @transform_2, window_bounds = array<i64: 1, 128>}, {transform_indices = @transform_3, window_bounds = array<i64: 1, 128>}]} {
    %c0 = arith.constant 0 : index
    %c0_0 = arith.constant 0 : index
    %c0_1 = arith.constant 0 : index
    %0 = vector.load %arg1[%c0, %c0_0, %c0_1] : memref<2x8x128xf32, #tpu.memory_space<vmem>>, vector<1x8x128xf32>
    %1 = vector.shape_cast %0 : vector<1x8x128xf32> to vector<8x128xf32>
    %c1 = arith.constant 1 : index
    %c0_2 = arith.constant 0 : index
    %c0_3 = arith.constant 0 : index
    %2 = vector.load %arg1[%c1, %c0_2, %c0_3] : memref<2x8x128xf32, #tpu.memory_space<vmem>>, vector<1x8x128xf32>
    %3 = vector.shape_cast %2 : vector<1x8x128xf32> to vector<8x128xf32>
    %c0_4 = arith.constant 0 : index
    %c0_5 = arith.constant 0 : index
    %4 = vector.load %arg2[%c0_4, %c0_5] : memref<8x128xi32, #tpu.memory_space<vmem>>, vector<8x128xi32>
    %5 = arith.subf %3, %1 : vector<8x128xf32>
    %cst = arith.constant 0.000000e+00 : f32
    %6 = vector.broadcast %cst : f32 to vector<8x128xf32>
    %7 = arith.maximumf %5, %6 : vector<8x128xf32>
    %8 = math.absf %5 : vector<8x128xf32>
    %cst_6 = arith.constant 0.000000e+00 : f32
    %9 = vector.broadcast %cst_6 : f32 to vector<8x128xf32>
    %10 = arith.subf %9, %8 : vector<8x128xf32>
    %11 = math.exp %10 : vector<8x128xf32>
    %12 = math.log1p %11 : vector<8x128xf32>
    %13 = arith.addf %7, %12 : vector<8x128xf32>
    %c1_i32 = arith.constant 1 : i32
    %14 = vector.broadcast %c1_i32 : i32 to vector<8x128xi32>
    %15 = arith.cmpi eq, %4, %14 : vector<8x128xi32>
    %cst_7 = arith.constant 0.000000e+00 : f32
    %16 = vector.broadcast %cst_7 : f32 to vector<8x128xf32>
    %17 = arith.select %15, %5, %16 : vector<8x128xi1>, vector<8x128xf32>
    %18 = arith.subf %13, %17 : vector<8x128xf32>
    %c-1_i32 = arith.constant -1 : i32
    %19 = vector.broadcast %c-1_i32 : i32 to vector<8x128xi32>
    %20 = arith.cmpi ne, %4, %19 : vector<8x128xi32>
    %cst_8 = arith.constant 0.000000e+00 : f32
    %21 = vector.broadcast %cst_8 : f32 to vector<8x128xf32>
    %22 = arith.select %20, %18, %21 : vector<8x128xi1>, vector<8x128xf32>
    %23 = arith.extui %20 : vector<8x128xi1> to vector<8x128xi32>
    %24 = arith.sitofp %23 : vector<8x128xi32> to vector<8x128xf32>
    %cst_9 = arith.constant dense<0.000000e+00> : vector<128xf32>
    %25 = vector.multi_reduction <add>, %22, %cst_9 [0] : vector<8x128xf32> to vector<128xf32>
    %26 = vector.shape_cast %25 : vector<128xf32> to vector<1x128xf32>
    %c0_10 = arith.constant 0 : index
    %c0_11 = arith.constant 0 : index
    %27 = vector.load %arg3[%c0_10, %c0_11] : memref<1x128xf32, #tpu.memory_space<vmem>>, vector<1x128xf32>
    tpu.vector_store %arg3[%c0_10, %c0_11], %26 {strides = array<i32>} : memref<1x128xf32, #tpu.memory_space<vmem>>, vector<1x128xf32>,
    %cst_12 = arith.constant dense<0.000000e+00> : vector<128xf32>
    %28 = vector.multi_reduction <add>, %24, %cst_12 [0] : vector<8x128xf32> to vector<128xf32>
    %29 = vector.shape_cast %28 : vector<128xf32> to vector<1x128xf32>
    %c0_13 = arith.constant 0 : index
    %c0_14 = arith.constant 0 : index
    %30 = vector.load %arg4[%c0_13, %c0_14] : memref<1x128xf32, #tpu.memory_space<vmem>>, vector<1x128xf32>
    tpu.vector_store %arg4[%c0_13, %c0_14], %29 {strides = array<i32>} : memref<1x128xf32, #tpu.memory_space<vmem>>, vector<1x128xf32>,
    return
  }
  func.func @transform_0(%arg0: i32) -> (i32, i32, i32) {
    %c0_i32 = arith.constant 0 : i32
    %c0_i32_0 = arith.constant 0 : i32
    %c0_i32_1 = arith.constant 0 : i32
    return %c0_i32, %arg0, %c0_i32_0 : i32, i32, i32
  }
  func.func @transform_1(%arg0: i32) -> (i32, i32) {
    %c0_i32 = arith.constant 0 : i32
    %c0_i32_0 = arith.constant 0 : i32
    return %arg0, %c0_i32 : i32, i32
  }
  func.func @transform_2(%arg0: i32) -> (i32, i32) {
    %c0_i32 = arith.constant 0 : i32
    %c0_i32_0 = arith.constant 0 : i32
    return %c0_i32, %arg0 : i32, i32
  }
  func.func @transform_3(%arg0: i32) -> (i32, i32) {
    %c0_i32 = arith.constant 0 : i32
    %c0_i32_0 = arith.constant 0 : i32
    return %c0_i32, %arg0 : i32, i32
  }
}

</mosaic_0001>

<bundles_post_ra>
// kernel: tpu_custom_call.1
= control target key start
LH: loop header
LB: loop body
LE: loop exit
PB: predicated region body
PF: predicated region fallthrough
CT: control target
= control target key end

     0   :  { %9 = vsyncpa [#allocation3], 0  ;;  %s297_s0 = inlined_call_operand.hbm [shape: f32[2,8,128], index: 0, kind: input, shape index: {}]   ;;  %s298_s1 = inlined_call_operand.hbm [shape: s32[8,128], index: 1, kind: input, shape index: {}]   ;;  %s299_s2 = inlined_call_operand.hbm [shape: f32[1,128], index: 2, kind: output, shape index: {0}]   ;;  %s300_s3 = inlined_call_operand.hbm [shape: f32[1,128], index: 3, kind: output, shape index: {1}]  }
   0x1   :  { %10 = vsyncpa [#allocation6], 0 }
   0x2   :  { %11 = vsyncpa [#allocation4], 0 }
   0x3   :  { %12 = vsyncpa [#allocation9], 0  ;;  %s220_s12 = smov [#allocation2]   ;;  %s124_s16 = scalar_lea.hbm %s297_s0, 256 }
   0x4   :  { %s18_s13 = sshll.u32 %s220_s12, 4  ;;  %p125_p0 = scmp.ne.s32.totalorder %s297_s0, %s124_s16  ;;  %s19_s13 = int_to_ptr.vmem [resolvable:$true] %s18_s13 }
   0x5   :  { %p128_p1 = scmp.lt.u32.totalorder %s124_s16, %s297_s0 }
   0x7   :  { %p130_p2 = pnand %p128_p1, %p125_p0 }
   0x9   :  { %133 = shalt.err (!%p130_p2)
}
   0xa   :  { %s134_s21 = scalar_lea.vmem %s19_s13, 256  ;;  %p139_p4 = scmp.lt.s32.totalorder %s19_s13, %s19_s13 }
   0xb   :  { %p135_p3 = scmp.ne.s32.totalorder %s19_s13, %s134_s21  ;;  %p140_p5 = scmp.lt.s32.totalorder %s134_s21, %s134_s21 }
   0xd   :  { %p141_p6 = por %p140_p5, %p139_p4 }
   0xf   :  { %p142_p7 = pnand %p141_p6, %p135_p3 }
  0x11   :  { %145 = shalt.err (!%p142_p7)
}
  0x12   :  { %s221_s22 = smov 128   ;;  %s222_s23 = smov 8  }
  0x13   :  { %24 = dma.hbm_to_vmem [thread:$0]  %s297_s0, 256, %s19_s13, [#allocation3], %s221_s22, %s221_s22, %s222_s23  }
  0x14   :  { %s223_s26 = smov [#allocation5]   ;;  %s146_s30 = scalar_lea.hbm %s298_s1, 128 }
  0x15   :  { %s31_s27 = sshll.u32 %s223_s26, 4  ;;  %p147_p8 = scmp.ne.s32.totalorder %s298_s1, %s146_s30  ;;  %s32_s27 = int_to_ptr.vmem [resolvable:$true] %s31_s27 }
  0x16   :  { %p150_p9 = scmp.lt.u32.totalorder %s146_s30, %s298_s1 }
  0x18   :  { %p152_p10 = pnand %p150_p9, %p147_p8 }
  0x1a   :  { %155 = shalt.err (!%p152_p10)
}
  0x1b   :  { %s156_s8 = scalar_lea.vmem %s32_s27, 128  ;;  %p161_p12 = scmp.lt.s32.totalorder %s32_s27, %s32_s27 }
  0x1c   :  { %p157_p11 = scmp.ne.s32.totalorder %s32_s27, %s156_s8  ;;  %p162_p13 = scmp.lt.s32.totalorder %s156_s8, %s156_s8 }
  0x1e   :  { %p163_p0 = por %p162_p13, %p161_p12 }
  0x20   :  { %p164_p1 = pnand %p163_p0, %p157_p11 }
  0x22   :  { %167 = shalt.err (!%p164_p1)
}
  0x23   :  { %34 = dma.hbm_to_vmem [thread:$0]  %s298_s1, 128, %s32_s27, [#allocation6]  }
  0x24   :  { %212 = dma.done.wait [#allocation3], 256  }
  0x25   :  { %213 = vsyncadd [#allocation3], 4294967040 }
  0x26   :  { %214 = dma.done.wait [#allocation6], 128  }
  0x27   :  { %215 = vsyncadd [#allocation6], 4294967168  ;;  %v41_v0 = vld [vmem:[#allocation2] sm:$0xff]  ;;  %v43_v1 = vld [vmem:[#allocation2 + $0x8] sm:$0xff]  ;;  %v224_v4 = vmov 0.0   ;;  %s225_s1 = smov [#allocation8]  }
  0x28   :  { %v44_v2 = vld [vmem:[#allocation5] sm:$0xff]  ;;  %v45_v3 = vsub.f32 %v43_v1, %v41_v0  ;;  %s98_s10 = sshll.u32 %s225_s1, 4  ;;  %s99_s10 = int_to_ptr.vmem [resolvable:$true] %s98_s10 }
  0x29   :  { %vm64_vm0 = vcmp.ne.s32.totalorder %v44_v2, 4294967295  ;;  %s168_s11 = scalar_lea.vmem %s99_s10, 16  ;;  %s172_s12 = scalar_lea.vmem %s99_s10, 32 }
  0x2a   :  { %v112_v5 = vsel %vm64_vm0, 1.0, %v224_v4  ;;  %v47_v6 = vand.u32 2147483647, %v45_v3  ;;  %p169_p2 = scmp.ne.s32.totalorder %s99_s10, %s168_s11  ;;  %p173_p3 = scmp.lt.s32.totalorder %s99_s10, %s99_s10 }
  0x2b   :  { %v75_v7 = vrot.slane %v112_v5, 4  ;;  %p174_p4 = scmp.lt.s32.totalorder %s172_s12, %s168_s11 }
  0x2c   :  { %v48_v8 = vsub.f32 0.0, %v47_v6 }
  0x2d   :  { %v76_v9 = vadd.f32 %v112_v5, %v75_v7  ;;  %p175_p5 = por %p174_p4, %p173_p3 }
  0x2e   :  { %v49_v10 = vmul.f32 1.442695, %v48_v8 }
  0x2f   :  { %v77_v11 = vrot.slane %v76_v9, 2  ;;  %p176_p6 = pnand %p175_p5, %p169_p2 }
  0x30   :  { %120 = vpow2.f32 %v49_v10 }
  0x31   :  { %v78_v12 = vadd.f32 %v77_v11, %v76_v9 }
  0x33   :  { %v79_v13 = vrot.slane %v78_v12, 1 }
  0x35   :  { %v80_v14 = vadd.f32 %v79_v13, %v78_v12 }
  0x37   :  { %81 = vst [vmem:[#allocation8] sm:$0x1] %v80_v14 }
  0x38   :  { %179 = shalt.err (!%p176_p6)
}
  0x39   :  { %s180_s15 = scalar_lea.hbm %s300_s3, 16 }
  0x3a   :  { %p181_p7 = scmp.ne.s32.totalorder %s300_s3, %s180_s15  ;;  %p184_p8 = scmp.lt.u32.totalorder %s180_s15, %s300_s3 }
  0x3c   :  { %p186_p9 = pnand %p184_p8, %p181_p7 }
  0x3e   :  { %189 = shalt.err (!%p186_p9)
}
  0x3f   :  { %101 = dma.vmem_to_hbm [thread:$0]  %s99_s10, 16, %s300_s3, [#allocation9]   ;;  %v121_v15 = vpop.eup %120  ;;  %v46_v22 = vmax.f32 %v45_v3, 0.0  ;;  %vm61_vm2 = vcmp.eq.s32.totalorder %v44_v2, 1 }
  0x40   :  { %v51_v16 = vadd.f32 1.0, %v121_v15  ;;  %v54_v17 = vmul.f32 -0.5, %v121_v15  ;;  %v57_v19 = vand.u32 2147483647, %v121_v15  ;;  %v62_v25 = vsel %vm61_vm2, %v45_v3, 0.0  ;;  %s226_s3 = smov [#allocation7]  }
  0x41   :  { %s88_s22 = sshll.u32 %s226_s3, 4  ;;  %s89_s22 = int_to_ptr.vmem [resolvable:$true] %s88_s22 }
  0x42   :  { %122 = vlog2.f32 %v51_v16  ;;  %v55_v18 = vadd.f32 1.0, %v54_v17  ;;  %vm58_vm1 = vcmp.lt.f32.partialorder %v57_v19, 0.0004427343  ;;  %s190_s23 = scalar_lea.vmem %s89_s22, 16  ;;  %s194_s24 = scalar_lea.vmem %s89_s22, 32 }
  0x43   :  { %p191_p10 = scmp.ne.s32.totalorder %s89_s22, %s190_s23  ;;  %p195_p11 = scmp.lt.s32.totalorder %s89_s22, %s89_s22 }
  0x44   :  { %v56_v20 = vmul.f32 %v121_v15, %v55_v18  ;;  %p196_p12 = scmp.lt.s32.totalorder %s194_s24, %s190_s23 }
  0x46   :  { %p197_p13 = por %p196_p12, %p195_p11 }
  0x48   :  { %p198_p0 = pnand %p197_p13, %p191_p10 }
  0x4c   :  { %v123_v21 = vpop.eup %122 }
  0x4d   :  { %v53_v23 = vmul.f32 0.6931472, %v123_v21 }
  0x4f   :  { %v59_v24 = vsel %vm58_vm1, %v56_v20, %v53_v23 }
  0x50   :  { %v60_v26 = vadd.f32 %v59_v24, %v46_v22 }
  0x52   :  { %v63_v27 = vsub.f32 %v60_v26, %v62_v25 }
  0x54   :  { %v65_v28 = vsel %vm64_vm0, %v63_v27, 0.0 }
  0x55   :  { %v68_v29 = vrot.slane %v65_v28, 4 }
  0x57   :  { %v69_v30 = vadd.f32 %v68_v29, %v65_v28 }
  0x59   :  { %v70_v31 = vrot.slane %v69_v30, 2 }
  0x5b   :  { %v71_v32 = vadd.f32 %v70_v31, %v69_v30 }
  0x5d   :  { %v72_v33 = vrot.slane %v71_v32, 1 }
  0x5f   :  { %v73_v34 = vadd.f32 %v72_v33, %v71_v32 }
  0x61   :  { %74 = vst [vmem:[#allocation7] sm:$0x1] %v73_v34 }
  0x62   :  { %201 = shalt.err (!%p198_p0)
}
  0x63   :  { %s202_s27 = scalar_lea.hbm %s299_s2, 16 }
  0x64   :  { %p203_p1 = scmp.ne.s32.totalorder %s299_s2, %s202_s27  ;;  %p206_p2 = scmp.lt.u32.totalorder %s202_s27, %s299_s2 }
  0x66   :  { %p208_p3 = pnand %p206_p2, %p203_p1 }
  0x68   :  { %211 = shalt.err (!%p208_p3)
}
  0x69   :  { %91 = dma.vmem_to_hbm [thread:$0]  %s89_s22, 16, %s299_s2, [#allocation4]  }
  0x6a   :  { %216 = dma.done.wait [#allocation4], 16  }
  0x6b   :  { %217 = vsyncadd [#allocation4], 4294967280 }
  0x6c   :  { %218 = dma.done.wait [#allocation9], 16  }
  0x6d   :  { %219 = vsyncadd [#allocation9], 4294967280 }
  0x6e   :  { %108 = vsyncpa [#allocation3], 1 }
  0x6f   :  { %109 = vsyncpa [#allocation6], 1 }
  0x70   :  { %110 = vsyncpa [#allocation4], 1 }
  0x71   :  { %111 = vsyncpa [#allocation9], 1 }

</bundles_post_ra>
